<compile_context>
chip_gen: v5e
topology: v5e:2x2
jax: 0.10.0
libtpu: 0.0.40
codegen_flags: <defaults>
</compile_context>

<pallas_src>
import functools

import jax
import jax.numpy as jnp
from jax.experimental import pallas as pl
from jax.experimental.pallas import tpu as pltpu


def _vmem_budget_bytes():
    """~75% of physical VMEM (v7x has the smallest at 64 MiB)."""
    cap = 64 << 20
    try:
        info = pltpu.get_tpu_info()
        cap = int(getattr(info, "vmem_capacity_bytes", cap))
    except Exception:
        pass
    return (cap * 3) // 4


# --------------------------------------------------------------------------- #
# Fused path: whole (C, HW) slab per batch element, TB batch elements / block.
# --------------------------------------------------------------------------- #
def _cam_fused_kernel(x_ref, w1_ref, b1_ref, alpha_ref, w2_ref, b2_ref, o_ref,
                      *, inv_hw, tb):
    alpha = alpha_ref[0]                                        # scalar from SMEM
    for b in range(tb):     # static unroll over batch elements packed in this block
        xb = x_ref[b]                                           # (C, HW) load once
        # Global average pool over the true spatial extent (no padding present).
        pooled = jnp.sum(xb.astype(jnp.float32), axis=-1, keepdims=True) * inv_hw  # (C,1)
        # Tiny MLP kept in column orientation: no lane/sublane reshuffles.
        h = jnp.dot(w1_ref[...], pooled, preferred_element_type=jnp.float32) + b1_ref[...]
        h = jnp.where(h >= 0.0, h, alpha * h)                   # PReLU (shared alpha)
        s = jnp.dot(w2_ref[...], h, preferred_element_type=jnp.float32) + b2_ref[...]
        gate = jax.nn.sigmoid(s).astype(xb.dtype)               # (C, 1)
        # Reuse the already-loaded xb for the output write.
        o_ref[b] = xb * gate + xb


def _cam_fused(x3, w1c, b1c, alpha_c, w2c, b2c, inv_hw, budget):
    B, C, HW = x3.shape
    Hid = w1c.shape[0]
    itemsize = jnp.dtype(x3.dtype).itemsize
    per_batch = C * HW * itemsize

    # Batch tile: largest divisor of B (<= 8 unroll cap) keeping the x block
    # <= ~4 MiB (past the DMA-efficiency knee) and inside the VMEM budget.
    tb = 1
    for t in range(1, min(B, 8) + 1):
        if B % t:
            continue
        if t > 1 and t * per_batch > (4 << 20):
            continue
        if 4 * t * per_batch + (4 << 20) > budget:
            continue
        tb = t

    param_bytes = 4 * (Hid * C + C * Hid + Hid + C)
    vmem_need = 4 * tb * per_batch + 4 * param_bytes + (2 << 20)
    vmem_limit = int(min(budget, max(vmem_need, 32 << 20)))     # always set (v5e fix)

    kernel = functools.partial(_cam_fused_kernel, inv_hw=inv_hw, tb=tb)
    cost = pl.CostEstimate(
        flops=int(3 * B * C * HW + 4 * B * C * Hid),
        transcendentals=int(B * C),
        bytes_accessed=int(2 * B * C * HW * itemsize + param_bytes))

    return pl.pallas_call(
        kernel,
        out_shape=jax.ShapeDtypeStruct((B, C, HW), x3.dtype),
        grid_spec=pltpu.PrefetchScalarGridSpec(
            num_scalar_prefetch=0,
            grid=(B // tb,),
            in_specs=[
                pl.BlockSpec((tb, C, HW), lambda i: (i, 0, 0)),   # x (full HW, no pad)
                pl.BlockSpec((Hid, C), lambda i: (0, 0)),         # w1
                pl.BlockSpec((Hid, 1), lambda i: (0, 0)),         # b1
                pl.BlockSpec(memory_space=pltpu.MemorySpace.SMEM),  # alpha
                pl.BlockSpec((C, Hid), lambda i: (0, 0)),         # w2
                pl.BlockSpec((C, 1), lambda i: (0, 0)),           # b2
            ],
            out_specs=pl.BlockSpec((tb, C, HW), lambda i: (i, 0, 0)),
        ),
        input_output_aliases={0: 0},        # in-place gate (no-op copy unless donated)
        cost_estimate=cost,
        compiler_params=pltpu.CompilerParams(
            dimension_semantics=("parallel",),
            vmem_limit_bytes=vmem_limit),
    )(x3, w1c, b1c, alpha_c, w2c, b2c)


# --------------------------------------------------------------------------- #
# Tiled fallback: large feature maps that do not fit a single VMEM block
# (matters mostly on v7x, 64 MiB VMEM).  Two passes over x.
# --------------------------------------------------------------------------- #
def _pool_tiled_kernel(x_ref, pooled_ref, acc_ref, *, hw, hw_tile, inv_hw):
    t = pl.program_id(1)

    @pl.when(t == 0)
    def _():
        acc_ref[...] = jnp.zeros_like(acc_ref)

    x = x_ref[...].astype(jnp.float32)                          # (1, C, hw_tile)
    if hw % hw_tile != 0:
        lane = jax.lax.broadcasted_iota(jnp.int32, x.shape, 2)
        x = jnp.where(lane + t * hw_tile < hw, x, 0.0)          # mask tail tile
    acc_ref[...] += jnp.sum(x, axis=-1)                         # (1, C)

    @pl.when(t == pl.num_programs(1) - 1)
    def _():
        pooled_ref[...] = (acc_ref[...] * inv_hw)[:, None, :]   # (1, 1, C)


def _apply_tiled_kernel(x_ref, gate_ref, o_ref):
    x = x_ref[...]                                              # (1, C, hw_tile)
    g = gate_ref[...].astype(x.dtype)                           # (1, C, 1)
    o_ref[...] = x * g + x


def _cam_tiled(x3, w1, b1, alpha, w2, b2, inv_hw, budget, hw_tile):
    B, C, HW = x3.shape
    itemsize = jnp.dtype(x3.dtype).itemsize
    f32 = jnp.float32

    if HW <= 128:
        hw_tile_eff = HW                      # single full-extent lane block
    else:
        if hw_tile is None:
            hw_tile = max(128, (budget - (6 << 20)) // (4 * C * itemsize))
        hw_tile_eff = max(128, (min(hw_tile, HW) // 128) * 128)
    nt = pl.cdiv(HW, hw_tile_eff)

    block_bytes = C * hw_tile_eff * itemsize
    vmem_limit = int(min(budget, max(4 * block_bytes + (2 << 20), 32 << 20)))

    # ---- pass 1: pooled mean over HW (HW axis is a reduction -> "arbitrary") ----
    pool_kernel = functools.partial(
        _pool_tiled_kernel, hw=HW, hw_tile=hw_tile_eff, inv_hw=inv_hw)
    pooled = pl.pallas_call(
        pool_kernel,
        out_shape=jax.ShapeDtypeStruct((B, 1, C), f32),
        grid_spec=pltpu.PrefetchScalarGridSpec(
            num_scalar_prefetch=0,
            grid=(B, nt),
            in_specs=[pl.BlockSpec((1, C, hw_tile_eff), lambda b, t: (b, 0, t))],
            out_specs=pl.BlockSpec((1, 1, C), lambda b, t: (b, 0, 0)),
            scratch_shapes=[pltpu.VMEM((1, C), f32)],
        ),
        cost_estimate=pl.CostEstimate(
            flops=int(B * C * HW), transcendentals=0,
            bytes_accessed=int(B * C * HW * itemsize)),
        compiler_params=pltpu.CompilerParams(
            dimension_semantics=("parallel", "arbitrary"),
            vmem_limit_bytes=vmem_limit),
    )(x3).reshape(B, C)

    # ---- tiny MLP + sigmoid on (B, C): O(B*C*Hid), negligible -> plain XLA ----
    h = pooled @ w1.astype(f32).T + b1.astype(f32)
    h = jnp.where(h >= 0.0, h, jnp.asarray(alpha, f32) * h)
    s = h @ w2.astype(f32).T + b2.astype(f32)
    gate = jax.nn.sigmoid(s).astype(x3.dtype).reshape(B, C, 1)

    # ---- pass 2: out = x * gate + x, tiled over (B, HW) -----------------------
    out = pl.pallas_call(
        _apply_tiled_kernel,
        out_shape=jax.ShapeDtypeStruct((B, C, HW), x3.dtype),
        grid_spec=pltpu.PrefetchScalarGridSpec(
            num_scalar_prefetch=0,
            grid=(B, nt),
            in_specs=[
                pl.BlockSpec((1, C, hw_tile_eff), lambda b, t: (b, 0, t)),
                pl.BlockSpec((1, C, 1), lambda b, t: (b, 0, 0)),
            ],
            out_specs=pl.BlockSpec((1, C, hw_tile_eff), lambda b, t: (b, 0, t)),
        ),
        input_output_aliases={0: 0},
        cost_estimate=pl.CostEstimate(
            flops=int(2 * B * C * HW), transcendentals=0,
            bytes_accessed=int(2 * B * C * HW * itemsize)),
        compiler_params=pltpu.CompilerParams(
            dimension_semantics=("parallel", "parallel"),
            vmem_limit_bytes=vmem_limit),
    )(x3, gate)
    return out


# --------------------------------------------------------------------------- #
# Public wrapper
# --------------------------------------------------------------------------- #
def cam_forward(x_nchw, w1, b1, alpha, w2, b2, *, force_tiled=False, hw_tile=None):
    """x_nchw: (B, C, H, W).  w1: (Hid, C), b1: (Hid,), alpha: scalar (PReLU),
    w2: (C, Hid), b2: (C,).  Returns (B, C, H, W) in x's dtype."""
    B, C, H, W = x_nchw.shape
    HW = H * W
    Hid = w1.shape[0]
    inv_hw = 1.0 / HW
    itemsize = jnp.dtype(x_nchw.dtype).itemsize

    x3 = x_nchw.reshape(B, C, HW)          # metadata-only reshape; no pad / slice
    budget = _vmem_budget_bytes()

    per_batch = C * HW * itemsize
    fused_ok = (4 * per_batch + (4 << 20)) <= budget

    if fused_ok and not force_tiled:
        f32 = jnp.float32
        out = _cam_fused(
            x3,
            w1.astype(f32),
            b1.reshape(Hid, 1).astype(f32),
            jnp.asarray(alpha, f32).reshape(1),
            w2.astype(f32),
            b2.reshape(C, 1).astype(f32),
            inv_hw, budget)
    else:
        out = _cam_tiled(x3, w1, b1, alpha, w2, b2, inv_hw, budget, hw_tile)

    return out.reshape(B, C, H, W)


def cam_reference(x_nchw, w1, b1, alpha, w2, b2):
    """Pure-JAX reference mirroring the PyTorch forward."""
    B, C, H, W = x_nchw.shape
    pooled = jnp.mean(x_nchw.astype(jnp.float32), axis=(2, 3))  # (B, C)
    h = pooled @ w1.T.astype(jnp.float32) + b1
    h = jnp.where(h >= 0.0, h, alpha * h)
    s = h @ w2.T.astype(jnp.float32) + b2
    gate = jax.nn.sigmoid(s).reshape(B, C, 1, 1).astype(x_nchw.dtype)
    return gate * x_nchw + x_nchw


if __name__ == "__main__":
    squeeze_factor = 4
    key = jax.random.PRNGKey(0)
    kx, kw1, kb1, kw2, kb2, kx2, kx3 = jax.random.split(key, 7)

    B, C = 2, 32
    Hid = C // squeeze_factor
    w1 = jax.random.normal(kw1, (Hid, C), dtype=jnp.float32) * 0.1
    b1 = jax.random.normal(kb1, (Hid,), dtype=jnp.float32) * 0.1
    w2 = jax.random.normal(kw2, (C, Hid), dtype=jnp.float32) * 0.1
    b2 = jax.random.normal(kb2, (C,), dtype=jnp.float32) * 0.1
    alpha = jnp.float32(0.25)   # PReLU default init

    # Case 1: H=W=16 (HW=256, lane-aligned), fused batched path.
    x = jax.random.normal(kx, (B, C, 16, 16), dtype=jnp.float32)
    ref = cam_reference(x, w1, b1, alpha, w2, b2)
    out = jax.block_until_ready(cam_forward(x, w1, b1, alpha, w2, b2))
    assert out.shape == x.shape
    assert jnp.allclose(out, ref, atol=1e-5, rtol=1e-5), \
        f"case1 max err {jnp.max(jnp.abs(out - ref))}"

    # Case 2: H=W=12 (HW=144, NOT a multiple of 128) -> full-extent block, no pad.
    x2 = jax.random.normal(kx2, (B, C, 12, 12), dtype=jnp.float32)
    ref2 = cam_reference(x2, w1, b1, alpha, w2, b2)
    out2 = jax.block_until_ready(cam_forward(x2, w1, b1, alpha, w2, b2))
    assert out2.shape == x2.shape
    assert jnp.allclose(out2, ref2, atol=1e-5, rtol=1e-5), \
        f"case2 max err {jnp.max(jnp.abs(out2 - ref2))}"

    # Case 3: force the HW-tiled fallback (v7x large-feature-map path) with a
    # small tile so the tail tile (400 = 3*128 + 16) exercises masking.
    x3 = jax.random.normal(kx3, (B, C, 20, 20), dtype=jnp.float32)
    ref3 = cam_reference(x3, w1, b1, alpha, w2, b2)
    out3 = jax.block_until_ready(
        cam_forward(x3, w1, b1, alpha, w2, b2, force_tiled=True, hw_tile=128))
    assert out3.shape == x3.shape
    assert jnp.allclose(out3, ref3, atol=1e-5, rtol=1e-5), \
        f"case3 max err {jnp.max(jnp.abs(out3 - ref3))}"

    print("KERNEL_OK")
</pallas_src>

<mosaic_0001>
module attributes {stable_mosaic.version = 11 : i64} {
  func.func @_cam_fused_kernel(%arg0: i32, %arg1: memref<2x32x256xf32, #tpu.memory_space<vmem>>, %arg2: memref<8x32xf32, #tpu.memory_space<vmem>>, %arg3: memref<8x1xf32, #tpu.memory_space<vmem>>, %arg4: memref<1xf32, #tpu.memory_space<smem>>, %arg5: memref<32x8xf32, #tpu.memory_space<vmem>>, %arg6: memref<32x1xf32, #tpu.memory_space<vmem>>, %arg7: memref<2x32x256xf32, #tpu.memory_space<vmem>>) attributes {dimension_semantics = [#tpu.dimension_semantics<parallel>], iteration_bounds = array<i64: 1>, scalar_prefetch = 0 : i64, scratch_operands = 0 : i64, tpu.core_type = #tpu.core_type<tc>, window_params = [{transform_indices = @transform_0, window_bounds = array<i64: 2, 32, 256>}, {pipeline_mode = #tpu.pipeline_mode<synchronous>, transform_indices = @transform_1, window_bounds = array<i64: 8, 32>}, {pipeline_mode = #tpu.pipeline_mode<synchronous>, transform_indices = @transform_2, window_bounds = array<i64: 8, 1>}, {transform_indices = @transform_3, window_bounds = array<i64: 1>}, {pipeline_mode = #tpu.pipeline_mode<synchronous>, transform_indices = @transform_4, window_bounds = array<i64: 32, 8>}, {pipeline_mode = #tpu.pipeline_mode<synchronous>, transform_indices = @transform_5, window_bounds = array<i64: 32, 1>}, {transform_indices = @transform_6, window_bounds = array<i64: 2, 32, 256>}]} {
    %c0 = arith.constant 0 : index
    %0 = memref.load %arg4[%c0] : memref<1xf32, #tpu.memory_space<smem>>
    %c0_0 = arith.constant 0 : index
    %c0_1 = arith.constant 0 : index
    %c0_2 = arith.constant 0 : index
    %1 = vector.load %arg1[%c0_0, %c0_1, %c0_2] : memref<2x32x256xf32, #tpu.memory_space<vmem>>, vector<1x32x256xf32>
    %2 = vector.shape_cast %1 : vector<1x32x256xf32> to vector<32x256xf32>
    %cst = arith.constant dense<0.000000e+00> : vector<32xf32>
    %3 = vector.multi_reduction <add>, %2, %cst [1] : vector<32x256xf32> to vector<32xf32>
    %4 = vector.shape_cast %3 : vector<32xf32> to vector<32x1xf32>
    %cst_3 = arith.constant 3.906250e-03 : f32
    %5 = vector.broadcast %cst_3 : f32 to vector<32x1xf32>
    %6 = arith.mulf %4, %5 : vector<32x1xf32>
    %c0_4 = arith.constant 0 : index
    %c0_5 = arith.constant 0 : index
    %7 = vector.load %arg2[%c0_4, %c0_5] : memref<8x32xf32, #tpu.memory_space<vmem>>, vector<8x32xf32>
    %cst_6 = arith.constant dense<0.000000e+00> : vector<8x1xf32>
    %8 = tpu.matmul %7, %6, %cst_6 {dimension_numbers = #tpu.dot_dimension_numbers<[1], [0], [0], [1], [0, 0, 1, 1], [], []>} : vector<8x32xf32>, vector<32x1xf32>, vector<8x1xf32> -> vector<8x1xf32>
    %c0_7 = arith.constant 0 : index
    %c0_8 = arith.constant 0 : index
    %9 = vector.load %arg3[%c0_7, %c0_8] : memref<8x1xf32, #tpu.memory_space<vmem>>, vector<8x1xf32>
    %10 = arith.addf %8, %9 : vector<8x1xf32>
    %cst_9 = arith.constant 0.000000e+00 : f32
    %11 = vector.broadcast %cst_9 : f32 to vector<8x1xf32>
    %12 = arith.cmpf oge, %10, %11 : vector<8x1xf32>
    %13 = vector.broadcast %0 : f32 to vector<8x1xf32>
    %14 = arith.mulf %13, %10 : vector<8x1xf32>
    %15 = arith.select %12, %10, %14 : vector<8x1xi1>, vector<8x1xf32>
    %c0_10 = arith.constant 0 : index
    %c0_11 = arith.constant 0 : index
    %16 = vector.load %arg5[%c0_10, %c0_11] : memref<32x8xf32, #tpu.memory_space<vmem>>, vector<32x8xf32>
    %cst_12 = arith.constant dense<0.000000e+00> : vector<32x1xf32>
    %17 = tpu.matmul %16, %15, %cst_12 {dimension_numbers = #tpu.dot_dimension_numbers<[1], [0], [0], [1], [0, 0, 1, 1], [], []>} : vector<32x8xf32>, vector<8x1xf32>, vector<32x1xf32> -> vector<32x1xf32>
    %c0_13 = arith.constant 0 : index
    %c0_14 = arith.constant 0 : index
    %18 = vector.load %arg6[%c0_13, %c0_14] : memref<32x1xf32, #tpu.memory_space<vmem>>, vector<32x1xf32>
    %19 = arith.addf %17, %18 : vector<32x1xf32>
    %20 = arith.negf %19 : vector<32x1xf32>
    %21 = math.exp %20 : vector<32x1xf32>
    %cst_15 = arith.constant 1.000000e+00 : f32
    %22 = vector.broadcast %cst_15 : f32 to vector<32x1xf32>
    %23 = arith.addf %22, %21 : vector<32x1xf32>
    %24 = arith.divf %22, %23 : vector<32x1xf32>
    %25 = vector.broadcast %24 : vector<32x1xf32> to vector<32x256xf32>
    %26 = arith.mulf %2, %25 : vector<32x256xf32>
    %27 = arith.addf %26, %2 : vector<32x256xf32>
    %c0_16 = arith.constant 0 : index
    %c0_17 = arith.constant 0 : index
    %c0_18 = arith.constant 0 : index
    %28 = vector.load %arg7[%c0_16, %c0_17, %c0_18] : memref<2x32x256xf32, #tpu.memory_space<vmem>>, vector<1x32x256xf32>
    %29 = vector.shape_cast %28 : vector<1x32x256xf32> to vector<32x256xf32>
    %30 = vector.shape_cast %27 : vector<32x256xf32> to vector<1x32x256xf32>
    tpu.vector_store %arg7[%c0_16, %c0_17, %c0_18], %30 {strides = array<i32>} : memref<2x32x256xf32, #tpu.memory_space<vmem>>, vector<1x32x256xf32>,
    %c1 = arith.constant 1 : index
    %c0_19 = arith.constant 0 : index
    %c0_20 = arith.constant 0 : index
    %31 = vector.load %arg1[%c1, %c0_19, %c0_20] : memref<2x32x256xf32, #tpu.memory_space<vmem>>, vector<1x32x256xf32>
    %32 = vector.shape_cast %31 : vector<1x32x256xf32> to vector<32x256xf32>
    %cst_21 = arith.constant dense<0.000000e+00> : vector<32xf32>
    %33 = vector.multi_reduction <add>, %32, %cst_21 [1] : vector<32x256xf32> to vector<32xf32>
    %34 = vector.shape_cast %33 : vector<32xf32> to vector<32x1xf32>
    %cst_22 = arith.constant 3.906250e-03 : f32
    %35 = vector.broadcast %cst_22 : f32 to vector<32x1xf32>
    %36 = arith.mulf %34, %35 : vector<32x1xf32>
    %c0_23 = arith.constant 0 : index
    %c0_24 = arith.constant 0 : index
    %37 = vector.load %arg2[%c0_23, %c0_24] : memref<8x32xf32, #tpu.memory_space<vmem>>, vector<8x32xf32>
    %cst_25 = arith.constant dense<0.000000e+00> : vector<8x1xf32>
    %38 = tpu.matmul %37, %36, %cst_25 {dimension_numbers = #tpu.dot_dimension_numbers<[1], [0], [0], [1], [0, 0, 1, 1], [], []>} : vector<8x32xf32>, vector<32x1xf32>, vector<8x1xf32> -> vector<8x1xf32>
    %c0_26 = arith.constant 0 : index
    %c0_27 = arith.constant 0 : index
    %39 = vector.load %arg3[%c0_26, %c0_27] : memref<8x1xf32, #tpu.memory_space<vmem>>, vector<8x1xf32>
    %40 = arith.addf %38, %39 : vector<8x1xf32>
    %cst_28 = arith.constant 0.000000e+00 : f32
    %41 = vector.broadcast %cst_28 : f32 to vector<8x1xf32>
    %42 = arith.cmpf oge, %40, %41 : vector<8x1xf32>
    %43 = vector.broadcast %0 : f32 to vector<8x1xf32>
    %44 = arith.mulf %43, %40 : vector<8x1xf32>
    %45 = arith.select %42, %40, %44 : vector<8x1xi1>, vector<8x1xf32>
    %c0_29 = arith.constant 0 : index
    %c0_30 = arith.constant 0 : index
    %46 = vector.load %arg5[%c0_29, %c0_30] : memref<32x8xf32, #tpu.memory_space<vmem>>, vector<32x8xf32>
    %cst_31 = arith.constant dense<0.000000e+00> : vector<32x1xf32>
    %47 = tpu.matmul %46, %45, %cst_31 {dimension_numbers = #tpu.dot_dimension_numbers<[1], [0], [0], [1], [0, 0, 1, 1], [], []>} : vector<32x8xf32>, vector<8x1xf32>, vector<32x1xf32> -> vector<32x1xf32>
    %c0_32 = arith.constant 0 : index
    %c0_33 = arith.constant 0 : index
    %48 = vector.load %arg6[%c0_32, %c0_33] : memref<32x1xf32, #tpu.memory_space<vmem>>, vector<32x1xf32>
    %49 = arith.addf %47, %48 : vector<32x1xf32>
    %50 = arith.negf %49 : vector<32x1xf32>
    %51 = math.exp %50 : vector<32x1xf32>
    %cst_34 = arith.constant 1.000000e+00 : f32
    %52 = vector.broadcast %cst_34 : f32 to vector<32x1xf32>
    %53 = arith.addf %52, %51 : vector<32x1xf32>
    %54 = arith.divf %52, %53 : vector<32x1xf32>
    %55 = vector.broadcast %54 : vector<32x1xf32> to vector<32x256xf32>
    %56 = arith.mulf %32, %55 : vector<32x256xf32>
    %57 = arith.addf %56, %32 : vector<32x256xf32>
    %c1_35 = arith.constant 1 : index
    %c0_36 = arith.constant 0 : index
    %c0_37 = arith.constant 0 : index
    %58 = vector.load %arg7[%c1_35, %c0_36, %c0_37] : memref<2x32x256xf32, #tpu.memory_space<vmem>>, vector<1x32x256xf32>
    %59 = vector.shape_cast %58 : vector<1x32x256xf32> to vector<32x256xf32>
    %60 = vector.shape_cast %57 : vector<32x256xf32> to vector<1x32x256xf32>
    tpu.vector_store %arg7[%c1_35, %c0_36, %c0_37], %60 {strides = array<i32>} : memref<2x32x256xf32, #tpu.memory_space<vmem>>, vector<1x32x256xf32>,
    return
  }
  func.func @transform_0(%arg0: i32) -> (i32, i32, i32) {
    %c0_i32 = arith.constant 0 : i32
    %c0_i32_0 = arith.constant 0 : i32
    %c0_i32_1 = arith.constant 0 : i32
    return %arg0, %c0_i32, %c0_i32_0 : i32, i32, i32
  }
  func.func @transform_1(%arg0: i32) -> (i32, i32) {
    %c0_i32 = arith.constant 0 : i32
    %c0_i32_0 = arith.constant 0 : i32
    %c0_i32_1 = arith.constant 0 : i32
    return %c0_i32, %c0_i32_0 : i32, i32
  }
  func.func @transform_2(%arg0: i32) -> (i32, i32) {
    %c0_i32 = arith.constant 0 : i32
    %c0_i32_0 = arith.constant 0 : i32
    %c0_i32_1 = arith.constant 0 : i32
    return %c0_i32, %c0_i32_0 : i32, i32
  }
  func.func @transform_3(%arg0: i32) -> i32 {
    %c0_i32 = arith.constant 0 : i32
    %c0_i32_0 = arith.constant 0 : i32
    return %c0_i32 : i32
  }
  func.func @transform_4(%arg0: i32) -> (i32, i32) {
    %c0_i32 = arith.constant 0 : i32
    %c0_i32_0 = arith.constant 0 : i32
    %c0_i32_1 = arith.constant 0 : i32
    return %c0_i32, %c0_i32_0 : i32, i32
  }
  func.func @transform_5(%arg0: i32) -> (i32, i32) {
    %c0_i32 = arith.constant 0 : i32
    %c0_i32_0 = arith.constant 0 : i32
    %c0_i32_1 = arith.constant 0 : i32
    return %c0_i32, %c0_i32_0 : i32, i32
  }
  func.func @transform_6(%arg0: i32) -> (i32, i32, i32) {
    %c0_i32 = arith.constant 0 : i32
    %c0_i32_0 = arith.constant 0 : i32
    %c0_i32_1 = arith.constant 0 : i32
    return %arg0, %c0_i32, %c0_i32_0 : i32, i32, i32
  }
}

</mosaic_0001>

<bundles_post_ra>
// kernel: tpu_custom_call.1
= control target key start
LH: loop header
LB: loop body
LE: loop exit
PB: predicated region body
PF: predicated region fallthrough
CT: control target
= control target key end

     0   :  { %12 = vsyncpa [#allocation4], 0  ;;  %s858_s0 = inlined_call_operand.hbm [shape: f32[2,32,256], index: 0, kind: input, shape index: {}, may-alias: {0,6}]   ;;  %s859_s1 = inlined_call_operand.vmem [shape: f32[8,32], index: 1, kind: input, shape index: {}]   ;;  %s860_s2 = inlined_call_operand.vmem [shape: f32[8,1], index: 2, kind: input, shape index: {}]   ;;  %s861_s3 = inlined_call_operand.<no memory space> [shape: f32[1], index: 3, kind: input, shape index: {}]   ;;  %s862_s4 = inlined_call_operand.vmem [shape: f32[32,8], index: 4, kind: input, shape index: {}]   ;;  %s863_s5 = inlined_call_operand.vmem [shape: f32[32,1], index: 5, kind: input, shape index: {}]   ;;  %s864_s6 = inlined_call_operand.hbm [shape: f32[2,32,256], index: 6, kind: output, shape index: {}, may-alias: {0,6}]  }
   0x1   :  { %13 = vsyncpa [#allocation5], 0  ;;  %s18_s23 = sshll.u32 %s858_s0, 4  ;;  %s620_s24 = smov [#allocation3]   ;;  %s19_s23 = int_to_ptr.hbm [resolvable:$true] %s18_s23 }
   0x2   :  { %s20_s25 = sshll.u32 %s620_s24, 4  ;;  %s621_s26 = smov 256   ;;  %s21_s25 = int_to_ptr.vmem [resolvable:$true] %s20_s25 }
   0x3   :  { %s622_s27 = smov 16  }
   0x4   :  { %26 = dma.hbm_to_vmem [thread:$0]  %s19_s23, 2048, %s21_s25, [#allocation4], %s621_s26, %s621_s26, %s622_s27  }
   0x5   :  { %616 = dma.done.wait [#allocation4], 2048  }
   0x6   :  { %617 = vsyncadd [#allocation4], 4294965248  ;;  %v666_v0 = vld [vmem:[#allocation3 + $0x70] sm:$0xff]  ;;  %v668_v1 = vld [vmem:[#allocation3 + $0x78] sm:$0xff]  ;;  %vm68_vm0 = vcmask 261120   ;;  %v93_v44 = vstv %s861_s3  ;;  %vm104_vm3 = vcmask 64512  }
   0x7   :  { %v670_v2 = vld [vmem:[#allocation3 + $0x50] sm:$0xff]  ;;  %v284_v3 = vadd.f32 %v668_v1, %v666_v0  ;;  %v674_v4 = vld [vmem:[#allocation3 + $0x58] sm:$0xff]  ;;  %v684_v9 = vld [vmem:[#allocation3 + $0x60] sm:$0xff]  ;;  %v623_v61 = vmov 0   ;;  %s495_s24 = sshll.u32 %s864_s6, 4  ;;  %s496_s24 = int_to_ptr.hbm [resolvable:$true] %s495_s24 }
   0x8   :  { %v676_v5 = vld [vmem:[#allocation3 + $0x30] sm:$0xff]  ;;  %v678_v6 = vld [vmem:[#allocation3 + $0x38] sm:$0xff]  ;;  %v278_v7 = vadd.f32 %v674_v4, %v670_v2  ;;  %v686_v10 = vld [vmem:[#allocation3 + $0x68] sm:$0xff]  ;;  %534 = vset.pattern.permute.xlu0 %v623_v61  ;;  %533 = vset.pattern.permute.xlu2 %v623_v61 }
   0x9   :  { %v59_v8 = vadd.f32 %v678_v6, %v676_v5  ;;  %285 = vadd.xlane.f32.xlu0 %v284_v3  ;;  %v688_v11 = vld [vmem:[#allocation3 + $0x40] sm:$0xff]  ;;  %v690_v12 = vld [vmem:[#allocation3 + $0x48] sm:$0xff]  ;;  %v281_v15 = vadd.f32 %v686_v10, %v684_v9  ;;  %v702_v18 = vld [vmem:[#allocation3 + $0x10] sm:$0xff]  ;;  %535 = vset.pattern.permute.xlu1 %v623_v61 }
   0xa   :  { %279 = vadd.xlane.f32.xlu1 %v278_v7  ;;  %v692_v13 = vld [vmem:[#allocation3 + $0x20] sm:$0xff]  ;;  %v694_v14 = vld [vmem:[#allocation3 + $0x28] sm:$0xff]  ;;  %v275_v16 = vadd.f32 %v690_v12, %v688_v11  ;;  %v704_v19 = vld [vmem:[#allocation3 + $0x18] sm:$0xff] }
   0xb   :  { %60 = vadd.xlane.f32.xlu2 %v59_v8  ;;  %v56_v17 = vadd.f32 %v694_v14, %v692_v13  ;;  %v706_v20 = vld [vmem:[#allocation3] sm:$0xff]  ;;  %v708_v21 = vld [vmem:[#allocation3 + $0x8] sm:$0xff]  ;;  %v53_v22 = vadd.f32 %v704_v19, %v702_v18  ;;  %v98_v53 = vld [vmem:[%s862_s4 + $0x10] sm:$0xff] }
   0xc   :  { %v50_v23 = vadd.f32 %v708_v21, %v706_v20  ;;  %v291_v36 = vld [vmem:[%s859_s1] sm:$0xff]  ;;  %v97_v52 = vld [vmem:[%s862_s4 + $0x8] sm:$0xff]  ;;  %v99_v54 = vld [vmem:[%s862_s4 + $0x18] sm:$0xff] }
   0xd   :  { %v67_v41 = vld [vmem:[%s860_s2] sm:$0xff]  ;;  %v101_v56 = vld [vmem:[%s863_s5 + $0x8] sm:$0xff]  ;;  %v102_v3 = vld [vmem:[%s863_s5 + $0x10] sm:$0xff] }
   0xe   :  { %v96_v51 = vld [vmem:[%s862_s4] sm:$0xff] }
   0xf   :  { %v100_v55 = vld [vmem:[%s863_s5] sm:$0xff] }
  0x11   :  { %282 = vadd.xlane.f32.xlu0 %v281_v15 }
  0x12   :  { %276 = vadd.xlane.f32.xlu1 %v275_v16 }
  0x13   :  { %57 = vadd.xlane.f32.xlu2 %v56_v17 }
  0x19   :  { %54 = vadd.xlane.f32.xlu0 %v53_v22 }
  0x1a   :  { %51 = vadd.xlane.f32.xlu1 %v50_v23 }
  0x7c   :  { %v286_v24 = vpop.xlane.xlu0 %285 }
  0x7d   :  { %v280_v25 = vpop.xlane.xlu1 %279  ;;  %v290_v26 = vmul.f32 0.00390625, %v286_v24 }
  0x7e   :  { %v61_v27 = vpop.xlane.xlu2 %60  ;;  %v288_v34 = vmul.f32 0.00390625, %v280_v25 }
  0x7f   :  { %v65_v28 = vmul.f32 0.00390625, %v61_v27  ;;  %308 = vmatpush.msra.mxu2 %v290_v26 }
  0x81   :  { %84 = vmatpush.msra.mxu0 %v65_v28 }
  0x84   :  { %v283_v29 = vpop.xlane.xlu0 %282 }
  0x85   :  { %v289_v30 = vmul.f32 0.00390625, %v283_v29  ;;  %v277_v31 = vpop.xlane.xlu1 %276 }
  0x86   :  { %v58_v32 = vpop.xlane.xlu2 %57  ;;  %v287_v35 = vmul.f32 0.00390625, %v277_v31 }
  0x87   :  { %v64_v33 = vmul.f32 0.00390625, %v58_v32  ;;  %309 = vmatpush.msra.mxu2 %v289_v30  ;;  %v103_v30 = vld [vmem:[%s863_s5 + $0x18] sm:$0xff]  ;;  %s624_s5 = smov [#allocation6]  }
  0x88   :  { %s493_s21 = sshll.u32 %s624_s5, 4  ;;  %s494_s21 = int_to_ptr.vmem [resolvable:$true] %s493_s21 }
  0x89   :  { %85 = vmatpush.msra.mxu0 %v64_v33  ;;  %310 = vmatpush.msra.mxu2 %v288_v34 }
  0x8b   :  { %311 = vmatpush.msra.mxu2 %v287_v35 }
  0x8c   :  { %517 = vmatmul.msk.f32.vlgmr.msra.gmra.mxu2 %vm68_vm0, %v291_v36  ;;  %v55_v37 = vpop.xlane.xlu0 %54 }
  0x8d   :  { %v63_v38 = vmul.f32 0.00390625, %v55_v37  ;;  %v52_v39 = vpop.xlane.xlu1 %51 }
  0x8e   :  { %v62_v40 = vmul.f32 0.00390625, %v52_v39 }
  0x8f   :  { %86 = vmatpush.msra.mxu0 %v63_v38 }
  0x91   :  { %87 = vmatpush.msra.mxu0 %v62_v40 }
  0x92   :  { %508 = vmatmul.msk.f32.vlgmr.msra.gmra.mxu0 %vm68_vm0, %v291_v36 }
 0x10f   :  { %v89_v42 = vpop.f32.mrf.mxu0  ;;  %v313_v43 = vpop.f32.mrf.mxu2 }
 0x110   :  { %v90_v45 = vadd.f32 %v89_v42, %v67_v41  ;;  %v314_v46 = vadd.f32 %v313_v43, %v67_v41 }
 0x112   :  { %vm92_vm1 = vcmp.ge.f32.partialorder %v90_v45, 0.0  ;;  %v94_v47 = vmul.f32 %v93_v44, %v90_v45  ;;  %vm316_vm2 = vcmp.ge.f32.partialorder %v314_v46, 0.0  ;;  %v317_v48 = vmul.f32 %v314_v46, %v93_v44 }
 0x114   :  { %v95_v49 = vsel %vm92_vm1, %v90_v45, %v94_v47  ;;  %v318_v50 = vsel %vm316_vm2, %v314_v46, %v317_v48 }
 0x115   :  { %132 = vmatpush.msrb.mxu0 %v95_v49  ;;  %526 = vmatpush.msra.mxu1 %v95_v49 }
 0x116   :  { %354 = vmatpush.msrb.mxu2 %v318_v50  ;;  %527 = vmatpush.msra.mxu3 %v318_v50 }
 0x117   :  { %509 = vmatmul.msk.f32.vlgmr.msrb.gmra.mxu0 %vm104_vm3, %v96_v51  ;;  %510 = vmatmul.msk.f32.vlgmr.msra.gmra.mxu1 %vm104_vm3, %v97_v52 }
 0x118   :  { %519 = vmatmul.msk.f32.vlgmr.msra.gmra.mxu3 %vm104_vm3, %v97_v52  ;;  %518 = vmatmul.msk.f32.vlgmr.msrb.gmra.mxu2 %vm104_vm3, %v96_v51 }
 0x11f   :  { %511 = vmatmul.msk.f32.gmra.mxu1 %vm104_vm3, %v98_v53 }
 0x120   :  { %520 = vmatmul.msk.f32.gmra.mxu3 %vm104_vm3, %v98_v53 }
 0x127   :  { %512 = vmatmul.msk.f32.gmra.mxu1 %vm104_vm3, %v99_v54 }
 0x128   :  { %521 = vmatmul.msk.f32.gmra.mxu3 %vm104_vm3, %v99_v54 }
 0x194   :  { %v134_v57 = vpop.f32.mrf.mxu0  ;;  %v137_v58 = vpop.f32.mrf.mxu1 }
 0x195   :  { %v135_v59 = vadd.f32 %v134_v57, %v100_v55  ;;  %v138_v60 = vadd.f32 %v137_v58, %v101_v56 }
 0x197   :  { %v513_v62 = vmul.f32 -1.442695, %v135_v59  ;;  %v514_v63 = vmul.f32 -1.442695, %v138_v60 }
 0x199   :  { %536 = vpow2.f32 %v513_v62 }
 0x19a   :  { %538 = vpow2.f32 %v514_v63 }
 0x19b   :  { %v359_v7 = vpop.f32.mrf.mxu3  ;;  %v356_v8 = vpop.f32.mrf.mxu2 }
 0x19c   :  { %v360_v15 = vadd.f32 %v359_v7, %v101_v56  ;;  %v140_v16 = vpop.f32.mrf.mxu1  ;;  %v357_v17 = vadd.f32 %v356_v8, %v100_v55 }
 0x19d   :  { %v141_v22 = vadd.f32 %v140_v16, %v102_v3 }
 0x19e   :  { %v523_v23 = vmul.f32 -1.442695, %v360_v15  ;;  %v522_v28 = vmul.f32 -1.442695, %v357_v17 }
 0x19f   :  { %v537_v24 = vpop.eup %536  ;;  %v515_v25 = vmul.f32 -1.442695, %v141_v22 }
 0x1a0   :  { %v539_v26 = vpop.eup %538  ;;  %v158_v27 = vadd.f32 1.0, %v537_v24  ;;  %540 = vpow2.f32 %v523_v23 }
 0x1a1   :  { %v159_v29 = vadd.f32 1.0, %v539_v26  ;;  %542 = vpow2.f32 %v515_v25 }
 0x1a2   :  { %544 = vrcp.f32 %v158_v27  ;;  %vm167_vm4 = vweird.f32 %v158_v27  ;;  %v171_v46 = vand.u32 2147483647, %v158_v27  ;;  %v173_v47 = vand.u32 2147483648, %v158_v27 }
 0x1a3   :  { %546 = vrcp.f32 %v159_v29  ;;  %v362_v31 = vpop.f32.mrf.mxu3  ;;  %v186_v53 = vand.u32 2147483647, %v159_v29  ;;  %v188_v54 = vand.u32 2147483648, %v159_v29  ;;  %vm182_vm9 = vweird.f32 %v159_v29 }
 0x1a4   :  { %548 = vpow2.f32 %v522_v28  ;;  %v363_v32 = vadd.f32 %v362_v31, %v102_v3  ;;  %v143_v33 = vpop.f32.mrf.mxu1  ;;  %v174_v60 = vor.u32 1.1754944e-38, %v173_v47  ;;  %vm172_vm8 = vcmp.eq.f32.partialorder %v171_v46, 8.507059e+37 }
 0x1a5   :  { %v144_v34 = vadd.f32 %v143_v33, %v103_v30  ;;  %v189_v16 = vor.u32 1.1754944e-38, %v188_v54  ;;  %vm187_vm11 = vcmp.eq.f32.partialorder %v186_v53, 8.507059e+37 }
 0x1a6   :  { %v541_v35 = vpop.eup %540  ;;  %v524_v36 = vmul.f32 -1.442695, %v363_v32 }
 0x1a7   :  { %v543_v37 = vpop.eup %542  ;;  %v747_v38 = vadd.f32 1.0, %v541_v35  ;;  %v516_v39 = vmul.f32 -1.442695, %v144_v34 }
 0x1a8   :  { %v545_v40 = vpop.eup %544  ;;  %v749_v41 = vadd.f32 1.0, %v543_v37  ;;  %550 = vpow2.f32 %v524_v36 }
 0x1a9   :  { %v547_v42 = vpop.eup %546  ;;  %552 = vrcp.f32 %v747_v38  ;;  %v163_v43 = vmul.f32 %v545_v40, %v158_v27  ;;  %vm168_vm5 = vweird.f32 %v545_v40  ;;  %vm404_vm1 = vweird.f32 %v747_v38 }
 0x1aa   :  { %v549_v44 = vpop.eup %548  ;;  %554 = vrcp.f32 %v749_v41  ;;  %v178_v45 = vmul.f32 %v547_v42, %v159_v29  ;;  %vm183_vm6 = vweird.f32 %v547_v42  ;;  %vm757_vm7 = vmor %vm167_vm4, %vm168_vm5  ;;  %v201_v33 = vand.u32 2147483647, %v749_v41 }
 0x1ab   :  { %v753_v48 = vadd.f32 1.0, %v549_v44  ;;  %556 = vpow2.f32 %v516_v39  ;;  %v365_v49 = vpop.f32.mrf.mxu3  ;;  %v164_v50 = vsub.f32 1.0, %v163_v43  ;;  %vm184_vm10 = vmor %vm182_vm9, %vm183_vm6  ;;  %vm197_vm15 = vweird.f32 %v749_v41 }
 0x1ac   :  { %v366_v51 = vadd.f32 %v365_v49, %v103_v30  ;;  %v179_v52 = vsub.f32 1.0, %v178_v45  ;;  %v203_v30 = vand.u32 2147483648, %v749_v41  ;;  %vm202_vm2 = vcmp.eq.f32.partialorder %v201_v33, 8.507059e+37 }
 0x1ad   :  { %558 = vrcp.f32 %v753_v48  ;;  %v165_v55 = vmul.f32 %v545_v40, %v164_v50  ;;  %v395_v34 = vand.u32 2147483648, %v753_v48  ;;  %vm389_vm13 = vweird.f32 %v753_v48 }
 0x1ae   :  { %v551_v56 = vpop.eup %550  ;;  %v525_v57 = vmul.f32 -1.442695, %v366_v51  ;;  %v180_v58 = vmul.f32 %v547_v42, %v179_v52  ;;  %v393_v37 = vand.u32 2147483647, %v753_v48  ;;  %v204_v44 = vor.u32 1.1754944e-38, %v203_v30 }
 0x1af   :  { %v761_v61 = vpop.eup %552  ;;  %v763_v62 = vadd.f32 1.0, %v551_v56  ;;  %v166_v63 = vadd.f32 %v545_v40, %v165_v55  ;;  %v396_v49 = vor.u32 1.1754944e-38, %v395_v34  ;;  %v408_v54 = vand.u32 2147483647, %v747_v38 }
 0x1b0   :  { %v555_v3 = vpop.eup %554  ;;  %560 = vpow2.f32 %v525_v57  ;;  %v181_v7 = vadd.f32 %v547_v42, %v180_v58  ;;  %v400_v8 = vmul.f32 %v761_v61, %v747_v38  ;;  %vm394_vm4 = vcmp.eq.f32.partialorder %v393_v37, 8.507059e+37 }
 0x1b1   :  { %v557_v15 = vpop.eup %556  ;;  %562 = vrcp.f32 %v763_v62  ;;  %v170_v17 = vsel %vm757_vm7, %v545_v40, %v166_v63  ;;  %v193_v22 = vmul.f32 %v555_v3, %v749_v41  ;;  %vm198_vm12 = vweird.f32 %v555_v3 }
 0x1b2   :  { %v771_v23 = vadd.f32 1.0, %v557_v15  ;;  %v185_v24 = vsel %vm184_vm10, %v547_v42, %v181_v7  ;;  %v175_v25 = vsel %vm172_vm8, %v174_v60, %v170_v17  ;;  %v401_v29 = vsub.f32 1.0, %v400_v8  ;;  %vm199_vm0 = vmor %vm197_vm15, %vm198_vm12 }
 0x1b3   :  { %v559_v26 = vpop.eup %558  ;;  %v190_v27 = vsel %vm187_vm11, %v189_v16, %v185_v24  ;;  %224 = vperm.xlu2 %533, %v175_v25   ;;  %v194_v28 = vsub.f32 1.0, %v193_v22  ;;  %vm405_vm5 = vweird.f32 %v761_v61  ;;  %v410_v56 = vand.u32 2147483648, %v747_v38 }
 0x1b4   :  { %564 = vrcp.f32 %v771_v23  ;;  %229 = vperm.xlu0 %534, %v190_v27   ;;  %v385_v31 = vmul.f32 %v559_v26, %v753_v48  ;;  %vm390_vm14 = vweird.f32 %v559_v26  ;;  %v402_v43 = vmul.f32 %v761_v61, %v401_v29  ;;  %vm406_vm8 = vmor %vm404_vm1, %vm405_vm5 }
 0x1b5   :  { %v195_v32 = vmul.f32 %v555_v3, %v194_v28  ;;  %vm790_vm3 = vmor %vm389_vm13, %vm390_vm14  ;;  %vm212_vm6 = vweird.f32 %v771_v23  ;;  %v218_v57 = vand.u32 2147483648, %v771_v23  ;;  %v216_v60 = vand.u32 2147483647, %v771_v23 }
 0x1b6   :  { %v561_v35 = vpop.eup %560  ;;  %v386_v36 = vsub.f32 1.0, %v385_v31  ;;  %v403_v53 = vadd.f32 %v761_v61, %v402_v43  ;;  %v411_v15 = vor.u32 1.1754944e-38, %v410_v56  ;;  %vm409_vm10 = vcmp.eq.f32.partialorder %v408_v54, 8.507059e+37 }
 0x1b7   :  { %v780_v39 = vpop.eup %562  ;;  %v782_v40 = vadd.f32 1.0, %v561_v35  ;;  %v196_v42 = vadd.f32 %v555_v3, %v195_v32  ;;  %v219_v16 = vor.u32 1.1754944e-38, %v218_v57  ;;  %vm217_vm11 = vcmp.eq.f32.partialorder %v216_v60, 8.507059e+37 }
 0x1b8   :  { %v387_v45 = vmul.f32 %v559_v26, %v386_v36  ;;  %v415_v52 = vmul.f32 %v780_v39, %v763_v62  ;;  %v407_v7 = vsel %vm406_vm8, %v761_v61, %v403_v53  ;;  %vm420_vm14 = vweird.f32 %v780_v39 }
 0x1b9   :  { %566 = vrcp.f32 %v782_v40  ;;  %v200_v46 = vsel %vm199_vm0, %v555_v3, %v196_v42  ;;  %v412_v24 = vsel %vm409_vm10, %v411_v15, %v407_v7  ;;  %v440_v61 = vand.u32 2147483648, %v782_v40 }
 0x1ba   :  { %v565_v50 = vpop.eup %564  ;;  %v205_v41 = vsel %vm202_vm2, %v204_v44, %v200_v46  ;;  %v388_v51 = vadd.f32 %v559_v26, %v387_v45  ;;  %v416_v63 = vsub.f32 1.0, %v415_v52  ;;  %v438_v28 = vand.u32 2147483647, %v782_v40 }
 0x1bb   :  { %234 = vperm.xlu1 %535, %v205_v41   ;;  %v208_v48 = vmul.f32 %v565_v50, %v771_v23  ;;  %vm213_vm7 = vweird.f32 %v565_v50  ;;  %vm434_vm13 = vweird.f32 %v782_v40  ;;  %v425_v31 = vand.u32 2147483648, %v763_v62 }
 0x1bc   :  { %v392_v55 = vsel %vm790_vm3, %v559_v26, %v388_v51  ;;  %vm214_vm9 = vmor %vm212_vm6, %vm213_vm7  ;;  %v417_v23 = vmul.f32 %v780_v39, %v416_v63  ;;  %v441_v33 = vor.u32 1.1754944e-38, %v440_v61  ;;  %vm419_vm0 = vweird.f32 %v763_v62 }
 0x1bd   :  { %v397_v58 = vsel %vm394_vm4, %v396_v49, %v392_v55  ;;  %v209_v59 = vsub.f32 1.0, %v208_v48  ;;  %v423_v34 = vand.u32 2147483647, %v763_v62  ;;  %vm439_vm1 = vcmp.eq.f32.partialorder %v438_v28, 8.507059e+37  ;;  %vm421_vm2 = vmor %vm419_vm0, %vm420_vm14 }
 0x1be   :  { %446 = vperm.xlu2 %533, %v397_v58   ;;  %v418_v30 = vadd.f32 %v780_v39, %v417_v23  ;;  %v426_v37 = vor.u32 1.1754944e-38, %v425_v31 }
 0x1bf   :  { %v567_v3 = vpop.eup %566  ;;  %v210_v8 = vmul.f32 %v565_v50, %v209_v59  ;;  %vm424_vm3 = vcmp.eq.f32.partialorder %v423_v34, 8.507059e+37 }
 0x1c0   :  { %v430_v17 = vmul.f32 %v567_v3, %v782_v40  ;;  %vm435_vm12 = vweird.f32 %v567_v3  ;;  %v422_v36 = vsel %vm421_vm2, %v780_v39, %v418_v30 }
 0x1c1   :  { %v211_v22 = vadd.f32 %v565_v50, %v210_v8  ;;  %vm436_vm15 = vmor %vm434_vm13, %vm435_vm12  ;;  %v427_v40 = vsel %vm424_vm3, %v426_v37, %v422_v36 }
 0x1c2   :  { %v431_v25 = vsub.f32 1.0, %v430_v17 }
 0x1c3   :  { %451 = vperm.xlu1 %535, %v412_v24   ;;  %v215_v38 = vsel %vm214_vm9, %v565_v50, %v211_v22 }
 0x1c4   :  { %v220_v26 = vsel %vm217_vm11, %v219_v16, %v215_v38  ;;  %v432_v27 = vmul.f32 %v567_v3, %v431_v25 }
 0x1c6   :  { %239 = vperm.xlu2 %533, %v220_v26   ;;  %v433_v29 = vadd.f32 %v567_v3, %v432_v27 }
 0x1c8   :  { %v437_v32 = vsel %vm436_vm15, %v567_v3, %v433_v29 }
 0x1c9   :  { %v442_v35 = vsel %vm439_vm1, %v441_v33, %v437_v32 }
 0x1cb   :  { %461 = vperm.xlu1 %535, %v442_v35  }
 0x1ce   :  { %456 = vperm.xlu2 %533, %v427_v40  }
 0x20d   :  { %v225_v42 = vpop.permute.xlu2 %224 }
 0x20e   :  { %v242_v43 = vmul.f32 %v225_v42, %v706_v20  ;;  %v243_v44 = vmul.f32 %v225_v42, %v708_v21 }
 0x210   :  { %v250_v45 = vadd.f32 %v242_v43, %v706_v20  ;;  %v251_v46 = vadd.f32 %v243_v44, %v708_v21 }
 0x212   :  { %258 = vst [vmem:[#allocation6] sm:$0xff] %v250_v45 }
 0x213   :  { %259 = vst [vmem:[#allocation6 + $0x8] sm:$0xff] %v251_v46 }
 0x218   :  { %v447_v62 = vpop.permute.xlu2 %446 }
 0x219   :  { %v464_v47 = vmul.f32 %v447_v62, %v688_v11  ;;  %v465_v39 = vmul.f32 %v447_v62, %v690_v12 }
 0x21b   :  { %v472_v49 = vadd.f32 %v464_v47, %v688_v11  ;;  %v473_v50 = vadd.f32 %v465_v39, %v690_v12 }
 0x21d   :  { %481 = vst [vmem:[#allocation6 + $0x40] sm:$0xff] %v472_v49 }
 0x21e   :  { %482 = vst [vmem:[#allocation6 + $0x48] sm:$0xff] %v473_v50 }
 0x220   :  { %v240_v41 = vpop.permute.xlu2 %239 }
 0x221   :  { %v248_v51 = vmul.f32 %v240_v41, %v676_v5  ;;  %v249_v20 = vmul.f32 %v240_v41, %v678_v6 }
 0x223   :  { %v256_v21 = vadd.f32 %v248_v51, %v676_v5  ;;  %v257_v52 = vadd.f32 %v249_v20, %v678_v6 }
 0x225   :  { %264 = vst [vmem:[#allocation6 + $0x30] sm:$0xff] %v256_v21 }
 0x226   :  { %265 = vst [vmem:[#allocation6 + $0x38] sm:$0xff] %v257_v52  ;;  %v230_v53 = vpop.permute.xlu0 %229 }
 0x227   :  { %v244_v54 = vmul.f32 %v230_v53, %v702_v18  ;;  %v245_v11 = vmul.f32 %v230_v53, %v704_v19 }
 0x228   :  { %v457_v48 = vpop.permute.xlu2 %456 }
 0x229   :  { %v252_v12 = vadd.f32 %v244_v54, %v702_v18  ;;  %v253_v55 = vadd.f32 %v245_v11, %v704_v19  ;;  %v468_v56 = vmul.f32 %v457_v48, %v684_v9  ;;  %v469_v57 = vmul.f32 %v457_v48, %v686_v10 }
 0x22b   :  { %260 = vst [vmem:[#allocation6 + $0x10] sm:$0xff] %v252_v12  ;;  %v476_v5 = vadd.f32 %v468_v56, %v684_v9  ;;  %v477_v6 = vadd.f32 %v469_v57, %v686_v10 }
 0x22c   :  { %261 = vst [vmem:[#allocation6 + $0x18] sm:$0xff] %v253_v55 }
 0x22d   :  { %485 = vst [vmem:[#allocation6 + $0x60] sm:$0xff] %v476_v5  ;;  %v235_v58 = vpop.permute.xlu1 %234 }
 0x22e   :  { %486 = vst [vmem:[#allocation6 + $0x68] sm:$0xff] %v477_v6  ;;  %v246_v59 = vmul.f32 %v235_v58, %v692_v13  ;;  %v247_v60 = vmul.f32 %v235_v58, %v694_v14 }
 0x230   :  { %v254_v18 = vadd.f32 %v246_v59, %v692_v13  ;;  %v255_v19 = vadd.f32 %v247_v60, %v694_v14 }
 0x232   :  { %262 = vst [vmem:[#allocation6 + $0x20] sm:$0xff] %v254_v18 }
 0x233   :  { %263 = vst [vmem:[#allocation6 + $0x28] sm:$0xff] %v255_v19 }
 0x235   :  { %v452_v63 = vpop.permute.xlu1 %451 }
 0x236   :  { %v466_v3 = vmul.f32 %v452_v63, %v670_v2  ;;  %v467_v9 = vmul.f32 %v452_v63, %v674_v4 }
 0x238   :  { %v474_v10 = vadd.f32 %v466_v3, %v670_v2  ;;  %v475_v7 = vadd.f32 %v467_v9, %v674_v4 }
 0x23a   :  { %483 = vst [vmem:[#allocation6 + $0x50] sm:$0xff] %v474_v10 }
 0x23b   :  { %484 = vst [vmem:[#allocation6 + $0x58] sm:$0xff] %v475_v7 }
 0x23d   :  { %v462_v8 = vpop.permute.xlu1 %461 }
 0x23e   :  { %v470_v15 = vmul.f32 %v462_v8, %v666_v0  ;;  %v471_v13 = vmul.f32 %v462_v8, %v668_v1 }
 0x240   :  { %v478_v14 = vadd.f32 %v470_v15, %v666_v0  ;;  %v479_v16 = vadd.f32 %v471_v13, %v668_v1 }
 0x242   :  { %487 = vst [vmem:[#allocation6 + $0x70] sm:$0xff] %v478_v14 }
 0x243   :  { %488 = vst [vmem:[#allocation6 + $0x78] sm:$0xff] %v479_v16 }
 0x244   :  { %501 = dma.vmem_to_hbm [thread:$0]  %s494_s21, 2048, %s496_s24, [#allocation5], %s621_s26, %s621_s26, %s622_s27  }
 0x245   :  { %618 = dma.done.wait [#allocation5], 2048  }
 0x246   :  { %619 = vsyncadd [#allocation5], 4294965248 }
 0x247   :  { %506 = vsyncpa [#allocation4], 1 }
 0x248   :  { %507 = vsyncpa [#allocation5], 1 }

</bundles_post_ra>
